<compile_context>
chip_gen: v7x
topology: tpu7x:2x2x1
jax: 0.10.0
libtpu: 0.0.40
codegen_flags: <defaults>
</compile_context>

<pallas_src>
import functools

import numpy as np
import jax
import jax.numpy as jnp
from jax.experimental import pallas as pl
from jax.experimental.pallas import tpu as pltpu

FEA_SCAL = 14
SCALE = 1.0 / 16.0
OUT_H = OUT_W = 7

_VMEM_BUDGET = 24 * 1024 * 1024   # working-set target: safe on v7x (64 MiB phys)
_VMEM_LIMIT = 32 * 1024 * 1024    # scoped VMEM limit passed to Mosaic


def _round_up(x, m):
    return ((x + m - 1) // m) * m


# -----------------------------------------------------------------------------
# Host-side glue: vectorized pooling-weight matrix (mirrors get_Cord +
# AdaptiveAvgPool2d bin math), built in float32, pre-transposed & lane-padded.
# -----------------------------------------------------------------------------
def build_pool_matrix_T(rois_np, H, W, RP_pad, fea_scal=FEA_SCAL, scale=SCALE):
    """Returns P_T of shape (H*W, RP_pad), float32, zero-padded along lanes."""
    rois = np.asarray(rois_np, dtype=np.float32)
    R = rois.shape[0]

    # get_Cord, vectorized over ROIs: floor/ceil then clamp to [0, fea_scal].
    x1 = np.maximum(np.floor(rois[:, 1] * scale), 0).astype(np.int64)
    y1 = np.maximum(np.floor(rois[:, 2] * scale), 0).astype(np.int64)
    x2 = np.minimum(np.ceil(rois[:, 3] * scale), fea_scal).astype(np.int64)
    y2 = np.minimum(np.ceil(rois[:, 4] * scale), fea_scal).astype(np.int64)
    h = y2 - y1
    w = x2 - x1

    # AdaptiveAvgPool2d bins: start = floor(i*in/out), end = ceil((i+1)*in/out)
    o = np.arange(OUT_H, dtype=np.int64)
    ys = y1[:, None] + (o[None, :] * h[:, None]) // OUT_H            # (R, 7)
    ye = y1[:, None] - ((-(o[None, :] + 1) * h[:, None]) // OUT_H)   # ceil
    xs = x1[:, None] + (o[None, :] * w[:, None]) // OUT_W
    xe = x1[:, None] - ((-(o[None, :] + 1) * w[:, None]) // OUT_W)

    yy = np.arange(H)
    xx = np.arange(W)
    row_m = ((yy[None, None, :] >= ys[:, :, None]) &
             (yy[None, None, :] < ye[:, :, None])).astype(np.float32)  # (R,7,H)
    col_m = ((xx[None, None, :] >= xs[:, :, None]) &
             (xx[None, None, :] < xe[:, :, None])).astype(np.float32)  # (R,7,W)

    cnt = ((ye - ys)[:, :, None] * (xe - xs)[:, None, :]).astype(np.float32)
    # NOTE: degenerate (zero-area) ROIs/bins emit zero weights here; the
    # PyTorch AdaptiveAvgPool2d reference would produce NaN / error on an
    # empty window.  This is a deliberate, documented divergence.
    cnt = np.maximum(cnt, 1.0)

    P = (row_m[:, :, None, :, None] * col_m[:, None, :, None, :]
         / cnt[:, :, :, None, None])                                  # (R,7,7,H,W)
    P = P.reshape(R * OUT_H * OUT_W, H * W)

    PT = np.zeros((H * W, RP_pad), dtype=np.float32)
    PT[:, :R * OUT_H * OUT_W] = P.T
    return PT


_PT_CACHE = {}
_PT_CACHE_MAX = 16   # bounded: dynamic per-step ROIs won't grow it unboundedly


def _get_pool_matrix(rois_np, H, W, RP_pad, compute_dtype):
    """Cache the device-resident P_T per (ROI set, shape, dtype)."""
    rois_np = np.ascontiguousarray(np.asarray(rois_np, dtype=np.float32))
    key = (rois_np.tobytes(), H, W, RP_pad, np.dtype(compute_dtype).name)
    hit = _PT_CACHE.get(key)
    if hit is None:
        pt = build_pool_matrix_T(rois_np, H, W, RP_pad)
        hit = jnp.asarray(pt, dtype=compute_dtype)
        if len(_PT_CACHE) >= _PT_CACHE_MAX:
            _PT_CACHE.pop(next(iter(_PT_CACHE)))
        _PT_CACHE[key] = hit
    return hit


# -----------------------------------------------------------------------------
# Pallas kernel: one full-K matmul per (M[, N]) tile.  No accumulator needed
# because the contraction (H*W) is a single block.
# -----------------------------------------------------------------------------
def roi_matmul_kernel(f_ref, p_ref, o_ref):
    o_ref[...] = jnp.dot(f_ref[...], p_ref[...],
                         preferred_element_type=jnp.float32).astype(o_ref.dtype)


def _choose_tiles(NC, RP, HW, itemsize):
    """Return (TM, TN, RP_pad, n_tiled)."""
    RP_pad = _round_up(RP, 128)
    pt_bytes = HW * RP_pad * itemsize
    if pt_bytes <= 8 * 1024 * 1024:
        # Resident-P_T path: P_T is a single constant block (DMA'd once); pick
        # the largest M tile whose double-buffered F + output tiles fit VMEM.
        tm = min(1024, _round_up(NC, 8))
        while tm > 8 and (pt_bytes + 2 * tm * HW * itemsize
                          + 2 * tm * RP_pad * 4) > _VMEM_BUDGET:
            tm = max(8, _round_up(tm // 2, 8))
        return tm, RP_pad, RP_pad, False
    # Huge ROI counts: tile the N axis (outermost) so each P_T tile is loaded
    # once per full M sweep; TN=256 fills the v6e/v7x MXU width.
    TN = 256
    RP_pad = _round_up(RP, TN)
    TM = min(512, _round_up(NC, 8))
    return TM, TN, RP_pad, True


@functools.partial(jax.jit,
                   static_argnames=("N", "C", "R", "TM", "TN", "n_tiled"))
def _roi_forward_impl(x, PT, *, N, C, R, TM, TN, n_tiled):
    H, W = x.shape[2], x.shape[3]
    HW = H * W
    NC = N * C
    RP = R * OUT_H * OUT_W
    RP_pad = PT.shape[1]
    NC_pad = _round_up(NC, TM)
    itemsize = np.dtype(PT.dtype).itemsize

    F = x.reshape(NC, HW).astype(PT.dtype)
    if NC_pad != NC:
        F = jnp.pad(F, ((0, NC_pad - NC), (0, 0)))

    if not n_tiled:
        grid = (NC_pad // TM,)
        in_specs = [
            pl.BlockSpec((TM, HW), lambda i: (i, 0)),
            # Constant block index -> Pallas keeps P_T resident, DMA'd once.
            pl.BlockSpec((HW, RP_pad), lambda i: (0, 0)),
        ]
        out_specs = pl.BlockSpec((TM, RP_pad), lambda i: (i, 0))
        # "parallel" lets the grid shard across TensorCores on v7x; no-op on
        # v5e/v6e.  TODO(synk): consider pltpu.CORE_PARALLEL if profiling on
        # v7x shows single-TC execution.
        dims = ("parallel",)
        f_reads, pt_reads = 1, 1
    else:
        grid = (RP_pad // TN, NC_pad // TM)   # j outermost, i innermost
        in_specs = [
            pl.BlockSpec((TM, HW), lambda j, i: (i, 0)),
            pl.BlockSpec((HW, TN), lambda j, i: (0, j)),
        ]
        out_specs = pl.BlockSpec((TM, TN), lambda j, i: (i, j))
        dims = ("arbitrary", "parallel")
        f_reads, pt_reads = RP_pad // TN, 1

    cost = pl.CostEstimate(
        flops=2 * NC_pad * HW * RP_pad,
        transcendentals=0,
        bytes_accessed=(itemsize * NC_pad * HW * f_reads
                        + itemsize * HW * RP_pad * pt_reads
                        + 4 * NC_pad * RP_pad),
    )

    out = pl.pallas_call(
        roi_matmul_kernel,
        out_shape=jax.ShapeDtypeStruct((NC_pad, RP_pad), jnp.float32),
        grid_spec=pltpu.PrefetchScalarGridSpec(
            num_scalar_prefetch=0,
            grid=grid,
            in_specs=in_specs,
            out_specs=out_specs,
        ),
        compiler_params=pltpu.CompilerParams(
            dimension_semantics=dims,
            vmem_limit_bytes=_VMEM_LIMIT,
        ),
        cost_estimate=cost,
    )(F, PT)

    # (N*C, R*49) -> (N, C, R, 7, 7) -> (R, N, C, 7, 7) -> (R*N, C, 7, 7)
    out = out[:NC, :RP].reshape(N, C, R, OUT_H, OUT_W)
    out = out.transpose(2, 0, 1, 3, 4)
    return out.reshape(R * N, C, OUT_H, OUT_W)


def torch_roi_forward(x, rois_np, *, compute_dtype=jnp.bfloat16):
    """x: (N, C, H, W) feature map; rois_np: (R, 5) host array [id, x1, y1, x2, y2].

    compute_dtype=bfloat16 (default) halves HBM traffic for this memory-bound
    kernel; accumulation stays f32.  Pass jnp.float32 for exact (1e-4) parity
    with the PyTorch reference.  The ROI batch-index column is ignored: every
    ROI is applied to every batch element, matching the original forward.
    """
    N, C, H, W = x.shape
    R = int(np.asarray(rois_np).shape[0])
    NC, HW, RP = N * C, H * W, R * OUT_H * OUT_W
    itemsize = np.dtype(compute_dtype).itemsize

    TM, TN, RP_pad, n_tiled = _choose_tiles(NC, RP, HW, itemsize)
    PT = _get_pool_matrix(rois_np, H, W, RP_pad, compute_dtype)
    return _roi_forward_impl(x, PT, N=N, C=C, R=R, TM=TM, TN=TN, n_tiled=n_tiled)


# -----------------------------------------------------------------------------
# Pure-numpy reference (mirrors the PyTorch forward) for a correctness check
# -----------------------------------------------------------------------------
def _adaptive_bins(in_size, out_size):
    starts = [(i * in_size) // out_size for i in range(out_size)]
    ends = [-((-(i + 1) * in_size) // out_size) for i in range(out_size)]
    return starts, ends


def reference_forward(x_np, rois_np, fea_scal=FEA_SCAL, scale=SCALE):
    import math
    N, C, _, _ = x_np.shape
    outs = []
    for roi in np.asarray(rois_np, dtype=np.float64):
        rx1 = max(math.floor(roi[1] * scale), 0)
        ry1 = max(math.floor(roi[2] * scale), 0)
        rx2 = min(math.ceil(roi[3] * scale), fea_scal)
        ry2 = min(math.ceil(roi[4] * scale), fea_scal)
        region = x_np[:, :, ry1:ry2, rx1:rx2]
        h, w = region.shape[2], region.shape[3]
        ys, ye = _adaptive_bins(h, OUT_H)
        xs, xe = _adaptive_bins(w, OUT_W)
        pooled = np.zeros((N, C, OUT_H, OUT_W), dtype=np.float32)
        for oy in range(OUT_H):
            for ox in range(OUT_W):
                pooled[:, :, oy, ox] = region[:, :, ys[oy]:ye[oy],
                                              xs[ox]:xe[ox]].mean(axis=(2, 3))
        outs.append(pooled)
    return np.concatenate(outs, 0)


if __name__ == "__main__":
    key = jax.random.PRNGKey(0)
    N, C, H, W = 2, 8, FEA_SCAL, FEA_SCAL
    x = jax.random.normal(key, (N, C, H, W), dtype=jnp.float32)

    # ROIs in image coordinates: [roi_id, x1, y1, x2, y2]; scaled by 1/16 inside.
    rois = np.array(
        [
            [0.0, 0.0, 0.0, 224.0, 224.0],
            [0.0, 16.0, 32.0, 128.0, 160.0],
            [0.0, 40.0, 8.0, 200.0, 100.0],
        ],
        dtype=np.float32,
    )

    ref = reference_forward(np.asarray(x), rois)

    # f32 compute path: exact parity with the PyTorch math.
    out_f32 = jax.block_until_ready(
        torch_roi_forward(x, rois, compute_dtype=jnp.float32))
    assert out_f32.shape == ref.shape, (out_f32.shape, ref.shape)
    np.testing.assert_allclose(np.asarray(out_f32), ref, rtol=1e-4, atol=1e-4)

    # Default bf16-operand path (f32 accumulation): halves HBM traffic.
    out_bf16 = jax.block_until_ready(torch_roi_forward(x, rois))
    assert out_bf16.shape == ref.shape
    np.testing.assert_allclose(np.asarray(out_bf16), ref, rtol=3e-2, atol=3e-2)

    # Second call hits the cached P_T and the jit cache (no host rebuild).
    out2 = jax.block_until_ready(torch_roi_forward(x, rois))
    np.testing.assert_allclose(np.asarray(out2), ref, rtol=3e-2, atol=3e-2)

    print("KERNEL_OK")
</pallas_src>

<mosaic_0001>
module attributes {stable_mosaic.version = 11 : i64} {
  func.func @roi_matmul_kernel(%arg0: i32, %arg1: memref<16x196xf32, #tpu.memory_space<vmem>>, %arg2: memref<196x256xf32, #tpu.memory_space<vmem>>, %arg3: memref<16x256xf32, #tpu.memory_space<vmem>>) attributes {dimension_semantics = [#tpu.dimension_semantics<parallel>], iteration_bounds = array<i64: 1>, scalar_prefetch = 0 : i64, scratch_operands = 0 : i64, tpu.core_type = #tpu.core_type<tc>, window_params = [{transform_indices = @transform_0, window_bounds = array<i64: 16, 196>}, {pipeline_mode = #tpu.pipeline_mode<synchronous>, transform_indices = @transform_1, window_bounds = array<i64: 196, 256>}, {transform_indices = @transform_2, window_bounds = array<i64: 16, 256>}]} {
    %c0 = arith.constant 0 : index
    %c0_0 = arith.constant 0 : index
    %0 = vector.load %arg1[%c0, %c0_0] : memref<16x196xf32, #tpu.memory_space<vmem>>, vector<16x196xf32>
    %c0_1 = arith.constant 0 : index
    %c0_2 = arith.constant 0 : index
    %1 = vector.load %arg2[%c0_1, %c0_2] : memref<196x256xf32, #tpu.memory_space<vmem>>, vector<196x256xf32>
    %cst = arith.constant dense<0.000000e+00> : vector<16x256xf32>
    %2 = tpu.matmul %0, %1, %cst {dimension_numbers = #tpu.dot_dimension_numbers<[1], [0], [0], [1], [0, 0, 1, 1], [], []>} : vector<16x196xf32>, vector<196x256xf32>, vector<16x256xf32> -> vector<16x256xf32>
    %c0_3 = arith.constant 0 : index
    %c0_4 = arith.constant 0 : index
    %3 = vector.load %arg3[%c0_3, %c0_4] : memref<16x256xf32, #tpu.memory_space<vmem>>, vector<16x256xf32>
    tpu.vector_store %arg3[%c0_3, %c0_4], %2 {strides = array<i32>} : memref<16x256xf32, #tpu.memory_space<vmem>>, vector<16x256xf32>,
    return
  }
  func.func @transform_0(%arg0: i32) -> (i32, i32) {
    %c0_i32 = arith.constant 0 : i32
    %c0_i32_0 = arith.constant 0 : i32
    return %arg0, %c0_i32 : i32, i32
  }
  func.func @transform_1(%arg0: i32) -> (i32, i32) {
    %c0_i32 = arith.constant 0 : i32
    %c0_i32_0 = arith.constant 0 : i32
    %c0_i32_1 = arith.constant 0 : i32
    return %c0_i32, %c0_i32_0 : i32, i32
  }
  func.func @transform_2(%arg0: i32) -> (i32, i32) {
    %c0_i32 = arith.constant 0 : i32
    %c0_i32_0 = arith.constant 0 : i32
    return %arg0, %c0_i32 : i32, i32
  }
}

</mosaic_0001>

<bundles_post_ra>
// kernel: _roi_forward_impl.1
= control target key start
LH: loop header
LB: loop body
LE: loop exit
PB: predicated region body
PF: predicated region fallthrough
CT: control target
= control target key end

     0   :  { %vm65_vm0 = vcmask 556032   ;;  %vm72_vm1 = vcmask 1043456   ;;  %s431_s1 = inlined_call_operand.vmem [shape: f32[196,256], index: 1, kind: input, shape index: {}]   ;;  %s432_s0 = inlined_call_operand.vmem [shape: f32[16,196], index: 0, kind: input, shape index: {}]   ;;  %s433_s2 = inlined_call_operand.vmem [shape: f32[16,256], index: 2, kind: output, shape index: {}]  }
   0x1   :  { %v16_v0 = vld [vmem:[%s431_s1 + $0x8] sm:$0xff]  ;;  %v18_v1 = vld [vmem:[%s431_s1 + $0x18] sm:$0xff]  ;;  %v15_v2 = vld [vmem:[%s431_s1] sm:$0xff] }
   0x2   :  { %v168_v3 = vpack.c.bf16 %v18_v1, %v16_v0  ;;  %v17_v4 = vld [vmem:[%s431_s1 + $0x10] sm:$0xff]  ;;  %v20_v5 = vld [vmem:[%s431_s1 + $0x28] sm:$0xff]  ;;  %v22_v6 = vld [vmem:[%s431_s1 + $0x38] sm:$0xff] }
   0x3   :  { %v170_v7 = vpack.c.bf16 %v17_v4, %v15_v2  ;;  %v172_v8 = vpack.c.bf16 %v22_v6, %v20_v5  ;;  %v19_v9 = vld [vmem:[%s431_s1 + $0x20] sm:$0xff]  ;;  %v21_v10 = vld [vmem:[%s431_s1 + $0x30] sm:$0xff]  ;;  %v24_v11 = vld [vmem:[%s431_s1 + $0x48] sm:$0xff] }
   0x4   :  { %169 = vmatprep.subr.bf16.mxu0 %v168_v3  ;;  %216 = vmatprep.subr.bf16.mxu1 %v168_v3  ;;  %v26_v12 = vld [vmem:[%s431_s1 + $0x58] sm:$0xff]  ;;  %v174_v13 = vpack.c.bf16 %v21_v10, %v19_v9  ;;  %v23_v15 = vld [vmem:[%s431_s1 + $0x40] sm:$0xff]  ;;  %v25_v16 = vld [vmem:[%s431_s1 + $0x50] sm:$0xff] }
   0x5   :  { %171 = vmatpush1.bf16.msra.mxu0 %v170_v7  ;;  %229 = vmatpush1.bf16.msra.mxu1 %v170_v7  ;;  %v176_v14 = vpack.c.bf16 %v26_v12, %v24_v11  ;;  %v28_v17 = vld [vmem:[%s431_s1 + $0x68] sm:$0xff]  ;;  %v30_v18 = vld [vmem:[%s431_s1 + $0x78] sm:$0xff]  ;;  %v178_v19 = vpack.c.bf16 %v25_v16, %v23_v15  ;;  %v27_v21 = vld [vmem:[%s431_s1 + $0x60] sm:$0xff] }
   0x6   :  { %173 = vmatprep.subr.bf16.mxu0 %v172_v8  ;;  %217 = vmatprep.subr.bf16.mxu1 %v172_v8  ;;  %v180_v20 = vpack.c.bf16 %v30_v18, %v28_v17  ;;  %v29_v22 = vld [vmem:[%s431_s1 + $0x70] sm:$0xff]  ;;  %v32_v23 = vld [vmem:[%s431_s1 + $0x88] sm:$0xff]  ;;  %v34_v24 = vld [vmem:[%s431_s1 + $0x98] sm:$0xff] }
   0x7   :  { %v182_v25 = vpack.c.bf16 %v29_v22, %v27_v21  ;;  %v184_v26 = vpack.c.bf16 %v34_v24, %v32_v23  ;;  %v31_v27 = vld [vmem:[%s431_s1 + $0x80] sm:$0xff]  ;;  %v33_v28 = vld [vmem:[%s431_s1 + $0x90] sm:$0xff]  ;;  %v36_v29 = vld [vmem:[%s431_s1 + $0xa8] sm:$0xff] }
   0x8   :  { %v38_v30 = vld [vmem:[%s431_s1 + $0xb8] sm:$0xff]  ;;  %v186_v31 = vpack.c.bf16 %v33_v28, %v31_v27  ;;  %v12_v32 = vld [vmem:[%s432_s0 + $0x8] sm:$0xff]  ;;  %v35_v34 = vld [vmem:[%s431_s1 + $0xa0] sm:$0xff] }
   0x9   :  { %175 = vmatpush1.bf16.msra.mxu0 %v174_v13  ;;  %230 = vmatpush1.bf16.msra.mxu1 %v174_v13  ;;  %v188_v33 = vpack.c.bf16 %v38_v30, %v36_v29  ;;  %v37_v35 = vld [vmem:[%s431_s1 + $0xb0] sm:$0xff]  ;;  %v14_v36 = vld [vmem:[%s432_s0 + $0x18] sm:$0xff]  ;;  %v40_v37 = vld [vmem:[%s431_s1 + $0xc8] sm:$0xff] }
   0xa   :  { %177 = vmatprep.subr.bf16.mxu0 %v176_v14  ;;  %218 = vmatprep.subr.bf16.mxu1 %v176_v14  ;;  %v42_v38 = vld [vmem:[%s431_s1 + $0xd8] sm:$0xff]  ;;  %v190_v39 = vpack.c.bf16 %v37_v35, %v35_v34  ;;  %v39_v41 = vld [vmem:[%s431_s1 + $0xc0] sm:$0xff]  ;;  %v41_v42 = vld [vmem:[%s431_s1 + $0xd0] sm:$0xff] }
   0xb   :  { %166 = vmatprep.mubr.msk.f32.mxu0 %vm65_vm0, %v12_v32  ;;  %167 = vmatprep.mubr.msk.f32.mxu1 %vm65_vm0, %v14_v36  ;;  %v192_v40 = vpack.c.bf16 %v42_v38, %v40_v37  ;;  %v44_v43 = vld [vmem:[%s431_s1 + $0xe8] sm:$0xff]  ;;  %v46_v44 = vld [vmem:[%s431_s1 + $0xf8] sm:$0xff]  ;;  %v194_v45 = vpack.c.bf16 %v41_v42, %v39_v41  ;;  %v43_v47 = vld [vmem:[%s431_s1 + $0xe0] sm:$0xff] }
   0xc   :  { %v196_v46 = vpack.c.bf16 %v46_v44, %v44_v43  ;;  %v45_v48 = vld [vmem:[%s431_s1 + $0xf0] sm:$0xff]  ;;  %v48_v49 = vld [vmem:[%s431_s1 + $0x108] sm:$0xff]  ;;  %v50_v50 = vld [vmem:[%s431_s1 + $0x118] sm:$0xff] }
   0xd   :  { %179 = vmatpush1.bf16.msra.mxu0 %v178_v19  ;;  %231 = vmatpush1.bf16.msra.mxu1 %v178_v19  ;;  %v198_v51 = vpack.c.bf16 %v45_v48, %v43_v47  ;;  %v200_v52 = vpack.c.bf16 %v50_v50, %v48_v49  ;;  %v47_v53 = vld [vmem:[%s431_s1 + $0x100] sm:$0xff]  ;;  %v49_v54 = vld [vmem:[%s431_s1 + $0x110] sm:$0xff]  ;;  %v52_v55 = vld [vmem:[%s431_s1 + $0x128] sm:$0xff] }
   0xe   :  { %181 = vmatprep.subr.bf16.mxu0 %v180_v20  ;;  %219 = vmatprep.subr.bf16.mxu1 %v180_v20  ;;  %v54_v56 = vld [vmem:[%s431_s1 + $0x138] sm:$0xff]  ;;  %v202_v57 = vpack.c.bf16 %v49_v54, %v47_v53  ;;  %v51_v59 = vld [vmem:[%s431_s1 + $0x120] sm:$0xff]  ;;  %v53_v60 = vld [vmem:[%s431_s1 + $0x130] sm:$0xff] }
   0xf   :  { %v204_v58 = vpack.c.bf16 %v54_v56, %v52_v55  ;;  %v56_v61 = vld [vmem:[%s431_s1 + $0x148] sm:$0xff]  ;;  %v58_v62 = vld [vmem:[%s431_s1 + $0x158] sm:$0xff]  ;;  %v206_v63 = vpack.c.bf16 %v53_v60, %v51_v59  ;;  %v55_v1 = vld [vmem:[%s431_s1 + $0x140] sm:$0xff] }
  0x10   :  { %v208_v0 = vpack.c.bf16 %v58_v62, %v56_v61  ;;  %v57_v2 = vld [vmem:[%s431_s1 + $0x150] sm:$0xff]  ;;  %v60_v3 = vld [vmem:[%s431_s1 + $0x168] sm:$0xff]  ;;  %v62_v4 = vld [vmem:[%s431_s1 + $0x178] sm:$0xff] }
  0x11   :  { %183 = vmatpush1.bf16.msra.mxu0 %v182_v25  ;;  %232 = vmatpush1.bf16.msra.mxu1 %v182_v25  ;;  %v210_v5 = vpack.c.bf16 %v57_v2, %v55_v1  ;;  %v212_v6 = vpack.c.bf16 %v62_v4, %v60_v3  ;;  %v59_v7 = vld [vmem:[%s431_s1 + $0x160] sm:$0xff]  ;;  %v61_v8 = vld [vmem:[%s431_s1 + $0x170] sm:$0xff]  ;;  %v64_v10 = vld [vmem:[%s431_s1 + $0x188] sm:$0xf] }
  0x12   :  { %185 = vmatprep.subr.bf16.mxu0 %v184_v26  ;;  %220 = vmatprep.subr.bf16.mxu1 %v184_v26  ;;  %v214_v9 = vpack.c.bf16 %v61_v8, %v59_v7  ;;  %v63_v11 = vld [vmem:[%s431_s1 + $0x180] sm:$0xf]  ;;  %v13_v13 = vld [vmem:[%s432_s0 + $0x10] sm:$0xff] }
  0x13   :  { %v11_v12 = vld [vmem:[%s432_s0] sm:$0xff] }
  0x15   :  { %187 = vmatpush1.bf16.msra.mxu0 %v186_v31  ;;  %233 = vmatpush1.bf16.msra.mxu1 %v186_v31 }
  0x16   :  { %189 = vmatprep.subr.bf16.mxu0 %v188_v33  ;;  %221 = vmatprep.subr.bf16.mxu1 %v188_v33 }
  0x19   :  { %191 = vmatpush1.bf16.msra.mxu0 %v190_v39  ;;  %234 = vmatpush1.bf16.msra.mxu1 %v190_v39 }
  0x1a   :  { %193 = vmatprep.subr.bf16.mxu0 %v192_v40  ;;  %222 = vmatprep.subr.bf16.mxu1 %v192_v40 }
  0x1d   :  { %195 = vmatpush1.bf16.msra.mxu0 %v194_v45  ;;  %235 = vmatpush1.bf16.msra.mxu1 %v194_v45 }
  0x1e   :  { %197 = vmatprep.subr.bf16.mxu0 %v196_v46  ;;  %223 = vmatprep.subr.bf16.mxu1 %v196_v46 }
  0x21   :  { %199 = vmatpush1.bf16.msra.mxu0 %v198_v51  ;;  %236 = vmatpush1.bf16.msra.mxu1 %v198_v51 }
  0x22   :  { %201 = vmatprep.subr.bf16.mxu0 %v200_v52  ;;  %224 = vmatprep.subr.bf16.mxu1 %v200_v52 }
  0x25   :  { %203 = vmatpush1.bf16.msra.mxu0 %v202_v57  ;;  %237 = vmatpush1.bf16.msra.mxu1 %v202_v57 }
  0x26   :  { %205 = vmatprep.subr.bf16.mxu0 %v204_v58  ;;  %225 = vmatprep.subr.bf16.mxu1 %v204_v58 }
  0x29   :  { %207 = vmatpush1.bf16.msra.mxu0 %v206_v63  ;;  %238 = vmatpush1.bf16.msra.mxu1 %v206_v63 }
  0x2a   :  { %209 = vmatprep.subr.bf16.mxu0 %v208_v0  ;;  %226 = vmatprep.subr.bf16.mxu1 %v208_v0 }
  0x2d   :  { %211 = vmatpush1.bf16.msra.mxu0 %v210_v5  ;;  %239 = vmatpush1.bf16.msra.mxu1 %v210_v5 }
  0x2e   :  { %213 = vmatprep.subr.bf16.mxu0 %v212_v6  ;;  %227 = vmatprep.subr.bf16.mxu1 %v212_v6 }
  0x31   :  { %215 = vmatpush1.bf16.msra.mxu0 %v214_v9  ;;  %240 = vmatpush1.bf16.msra.mxu1 %v214_v9 }
  0x32   :  { %164 = vmatprep.subr.msk.mxu0 %vm72_vm1, %v64_v10  ;;  %228 = vmatprep.subr.msk.mxu1 %vm72_vm1, %v64_v10 }
  0x35   :  { %165 = vmatpush1.msk.msra.mxu0 %vm72_vm1, %v63_v11  ;;  %241 = vmatpush1.msk.msra.mxu1 %vm72_vm1, %v63_v11 }
  0x36   :  { %144 = vmatmul.mubr.f32.vlgmr.msra.gmra.mrb[0].mxu0 %v11_v12  ;;  %150 = vmatmul.mubr.f32.vlgmr.msra.gmra.mrb[0].mxu1 %v13_v13 }
 0x109   :  { %v145_v14 = vpop.f32.mrb[0].mxu0  ;;  %v151_v15 = vpop.f32.mrb[0].mxu1 }
 0x10a   :  { %156 = vst [vmem:[%s433_s2] sm:$0xff] %v145_v14  ;;  %158 = vst [vmem:[%s433_s2 + $0x10] sm:$0xff] %v151_v15  ;;  %v147_v16 = vpop.f32.mrb[1].mxu0  ;;  %v153_v17 = vpop.f32.mrb[1].mxu1 }
 0x10b   :  { %157 = vst [vmem:[%s433_s2 + $0x8] sm:$0xff] %v147_v16  ;;  %159 = vst [vmem:[%s433_s2 + $0x18] sm:$0xff] %v153_v17 }

</bundles_post_ra>
